<compile_context>
chip_gen: v7x
topology: tpu7x:2x2x1
jax: 0.10.0
libtpu: 0.0.40
codegen_flags: <defaults>
</compile_context>

<pallas_src>
import jax
import jax.numpy as jnp
from jax.experimental import pallas as pl
from jax.experimental.pallas import tpu as pltpu


def _round_up(x: int, m: int) -> int:
    return (x + m - 1) // m * m


def _vmem_capacity_bytes() -> int:
    """Per-TensorCore VMEM capacity; conservative 64 MiB (v7x) fallback."""
    try:
        info = pltpu.get_tpu_info()
        cap = int(getattr(info, "vmem_capacity_bytes", 0) or 0)
        if cap > 0:
            return cap
    except Exception:
        pass
    return 64 * 1024 * 1024


# ---------------- kernel A: fully-resident weight stack (primary) ------------
def _resident_heads_kernel(x_ref, w1p_ref, b1_ref, w2_ref, b2_ref, o_ref):
    # x:   (tm, Dp)          streamed per M-tile
    # w1p: (Dp, Hn*Dp)       resident (all heads' Linear1, column-packed)
    # b1:  (Hn, 1, Dp) f32   resident
    # w2:  (Hn, Dp, Lp)      resident
    # b2:  (Hn, 1, Lp) f32   resident
    # o:   (Hn, tm, Lp) f32
    Hn = o_ref.shape[0]
    Dp = x_ref.shape[1]
    x = x_ref[...].astype(w1p_ref.dtype)
    # Linear1 for ALL heads at once: N = Hn*Dp fills the 256-wide MXU.
    h_all = jnp.dot(x, w1p_ref[...], preferred_element_type=jnp.float32)
    for i in range(Hn):  # static unroll; Hn is small
        h = jnp.maximum(h_all[:, i * Dp:(i + 1) * Dp] + b1_ref[i], 0.0)
        y = jnp.dot(h.astype(w2_ref.dtype), w2_ref[i],
                    preferred_element_type=jnp.float32) + b2_ref[i]
        o_ref[i] = y.astype(o_ref.dtype)


def _resident_heads_pallas(x2d, w1p, b1s, w2s, b2s, *, tm, vmem_limit):
    Mp, Dp = x2d.shape
    Hn, _, Lp = w2s.shape
    w_item = jnp.dtype(w1p.dtype).itemsize
    x_item = jnp.dtype(x2d.dtype).itemsize
    cost = pl.CostEstimate(
        flops=2 * Mp * Hn * Dp * (Dp + Lp) + 3 * Mp * Hn * (Dp + Lp),
        transcendentals=0,
        bytes_accessed=(Mp * Dp * x_item                 # x read once
                        + Hn * Dp * (Dp + Lp) * w_item   # weights read once
                        + Hn * (Dp + Lp) * 4             # biases
                        + Hn * Mp * Lp * 4),             # output written once
    )
    return pl.pallas_call(
        _resident_heads_kernel,
        out_shape=jax.ShapeDtypeStruct((Hn, Mp, Lp), jnp.float32),
        grid=(Mp // tm,),
        in_specs=[
            pl.BlockSpec((tm, Dp), lambda m: (m, 0)),            # streamed x
            pl.BlockSpec((Dp, Hn * Dp), lambda m: (0, 0)),       # resident W1 (packed)
            pl.BlockSpec((Hn, 1, Dp), lambda m: (0, 0, 0)),      # resident b1
            pl.BlockSpec((Hn, Dp, Lp), lambda m: (0, 0, 0)),     # resident W2
            pl.BlockSpec((Hn, 1, Lp), lambda m: (0, 0, 0)),      # resident b2
        ],
        out_specs=pl.BlockSpec((Hn, tm, Lp), lambda m: (0, m, 0)),
        compiler_params=pltpu.CompilerParams(
            dimension_semantics=("parallel",),
            vmem_limit_bytes=vmem_limit,
        ),
        cost_estimate=cost,
    )(x2d, w1p, b1s, w2s, b2s)


# ---------------- kernel B: heads-outer streaming (fallback) -----------------
def _streaming_heads_kernel(x_ref, w1_ref, b1_ref, w2_ref, b2_ref, o_ref):
    # x:(tm,Dp)  w1:(1,Dp,Dp)  b1:(1,1,Dp)  w2:(1,Dp,Lp)  b2:(1,1,Lp)  o:(1,tm,Lp)
    x = x_ref[...].astype(w1_ref.dtype)
    h = jnp.dot(x, w1_ref[0], preferred_element_type=jnp.float32)
    h = jnp.maximum(h + b1_ref[0], 0.0)
    y = jnp.dot(h.astype(w2_ref.dtype), w2_ref[0],
                preferred_element_type=jnp.float32) + b2_ref[0]
    o_ref[0] = y.astype(o_ref.dtype)


def _streaming_heads_pallas(x2d, w1s, b1s, w2s, b2s, *, tm, vmem_limit):
    Mp, Dp = x2d.shape
    Hn, _, Lp = w2s.shape
    w_item = jnp.dtype(w1s.dtype).itemsize
    x_item = jnp.dtype(x2d.dtype).itemsize
    # Heads OUTER: each head's W1/W2 is resident across all M-tiles (weights read
    # once per head); x (small) is re-read once per head instead.
    cost = pl.CostEstimate(
        flops=2 * Mp * Hn * Dp * (Dp + Lp) + 3 * Mp * Hn * (Dp + Lp),
        transcendentals=0,
        bytes_accessed=(Hn * Mp * Dp * x_item
                        + Hn * Dp * (Dp + Lp) * w_item
                        + Hn * (Dp + Lp) * 4
                        + Hn * Mp * Lp * 4),
    )
    return pl.pallas_call(
        _streaming_heads_kernel,
        out_shape=jax.ShapeDtypeStruct((Hn, Mp, Lp), jnp.float32),
        grid=(Hn, Mp // tm),                       # heads outer, M-tiles inner
        in_specs=[
            pl.BlockSpec((tm, Dp), lambda h, m: (m, 0)),
            pl.BlockSpec((1, Dp, Dp), lambda h, m: (h, 0, 0)),
            pl.BlockSpec((1, 1, Dp), lambda h, m: (h, 0, 0)),
            pl.BlockSpec((1, Dp, Lp), lambda h, m: (h, 0, 0)),
            pl.BlockSpec((1, 1, Lp), lambda h, m: (h, 0, 0)),
        ],
        out_specs=pl.BlockSpec((1, tm, Lp), lambda h, m: (h, m, 0)),
        compiler_params=pltpu.CompilerParams(
            dimension_semantics=("parallel", "parallel"),  # disjoint output blocks
            vmem_limit_bytes=vmem_limit,
        ),
        cost_estimate=cost,
    )(x2d, w1s, b1s, w2s, b2s)


# ------------------------------ Module glue ---------------------------------
def build_fused_head_params(key, d_model, out_dims, param_dtype=jnp.bfloat16):
    """Init per MLP.initialize_weights for nn.Linear (weight ~ N(0, 0.02), bias 0),
    stored as (in, out) so the kernel does x @ W.  Weights stacked over heads and
    zero-padded so D and L are multiples of 128 (lane-dense); stored in bf16 for
    MXU-native matmuls + halved weight DMA bytes; biases kept f32."""
    prefixes = list(out_dims.keys())
    Hn = len(prefixes)
    Dp = _round_up(d_model, 128)
    Lp = _round_up(max(out_dims.values()), 128)

    w1s = jnp.zeros((Hn, Dp, Dp), param_dtype)
    b1s = jnp.zeros((Hn, 1, Dp), jnp.float32)
    w2s = jnp.zeros((Hn, Dp, Lp), param_dtype)
    b2s = jnp.zeros((Hn, 1, Lp), jnp.float32)
    for i, prefix in enumerate(prefixes):
        L = out_dims[prefix]
        key, k1, k2 = jax.random.split(key, 3)
        w1 = (0.02 * jax.random.normal(k1, (d_model, d_model), jnp.float32)).astype(param_dtype)
        w2 = (0.02 * jax.random.normal(k2, (d_model, L), jnp.float32)).astype(param_dtype)
        w1s = w1s.at[i, :d_model, :d_model].set(w1)
        w2s = w2s.at[i, :d_model, :L].set(w2)

    # Column-packed Linear1 weights: [W1_0 | W1_1 | ... ] -> (Dp, Hn*Dp).
    w1p = jnp.transpose(w1s, (1, 0, 2)).reshape(Dp, Hn * Dp)

    return {
        "prefixes": prefixes,
        "out_dims": dict(out_dims),
        "d_model": d_model,
        "w1s": w1s, "b1s": b1s, "w2s": w2s, "b2s": b2s, "w1p": w1p,
    }


def multitask_forward(elm_agg_emb, fused, *, tm=None, force_path=None):
    """MultiTask.forward (all FCN heads fused): elm_agg_emb is (S, B, D);
    each head returns (B, S, L) like FCN (permute(1,0,2) -> Linearx2)."""
    S, B, D = elm_agg_emb.shape
    assert D == fused["d_model"]
    Hn, Dp, Lp = fused["w2s"].shape
    w_dtype = fused["w1s"].dtype
    w_item = jnp.dtype(w_dtype).itemsize

    # Row-permutation-invariant MLP: flatten without transposing the D-wide slab;
    # the (B, S, L) layout fix is applied to the small L-wide outputs instead.
    M = S * B
    if tm is None:
        tm = _round_up(M, 16) if M <= 512 else 256   # avoid M-padding waste at small M
    tm = max(16, _round_up(min(tm, _round_up(M, 16)), 16))  # bf16 sublane pack: mult of 16
    Mp = _round_up(M, tm)

    x2d = elm_agg_emb.reshape(M, D).astype(w_dtype)
    pad_m, pad_d = Mp - M, Dp - D
    if pad_m or pad_d:
        x2d = jnp.pad(x2d, ((0, pad_m), (0, pad_d)))

    vmem_cap = _vmem_capacity_bytes()
    # Resident-path VMEM footprint: weights counted x2 (in case constant-index
    # blocks are still double-buffered), x/out tiles double-buffered, plus the
    # f32 fat intermediate and its bf16 copy for the second matmul.
    resident_bytes = (
        2 * Hn * Dp * (Dp + Lp) * w_item
        + 2 * Hn * (Dp + Lp) * 4
        + 2 * tm * Dp * w_item
        + 2 * Hn * tm * Lp * 4
        + tm * Hn * Dp * (4 + w_item)
    )
    budget = int(0.80 * vmem_cap)
    if force_path is None:
        use_resident = resident_bytes <= budget
    else:
        use_resident = (force_path == "resident")
    vmem_limit = int(min(0.85 * vmem_cap, max(32 * 1024 * 1024, 2 * resident_bytes)))
    vmem_limit = max(vmem_limit, 16 * 1024 * 1024)

    if use_resident:
        out = _resident_heads_pallas(x2d, fused["w1p"], fused["b1s"],
                                     fused["w2s"], fused["b2s"],
                                     tm=tm, vmem_limit=vmem_limit)
    else:
        out = _streaming_heads_pallas(x2d, fused["w1s"], fused["b1s"],
                                      fused["w2s"], fused["b2s"],
                                      tm=tm, vmem_limit=vmem_limit)

    outs = {}
    for i, prefix in enumerate(fused["prefixes"]):
        L = fused["out_dims"][prefix]
        o = out[i, :M, :L].reshape(S, B, L)            # rows were (s, b)-ordered
        outs[prefix] = jnp.transpose(o, (1, 0, 2))     # FCN's permute(1,0,2): (B, S, L)
    return outs


def mlp_forward(feat_cat, fused, *, tm=None, force_path=None):
    """MLP.forward hot path: outs = self.head(feat_cat)."""
    return multitask_forward(feat_cat, fused, tm=tm, force_path=force_path)


# --------------------------------- main --------------------------------------
if __name__ == "__main__":
    key = jax.random.PRNGKey(0)

    # Small shapes consistent with the module: seq=8, batch=2, d_model=32
    S, B, D = 8, 2, 32
    out_dims = {"text_font": 16, "text_font_size": 8, "text_font_color": 24}

    key, kx = jax.random.split(key)
    feat_cat = jax.random.normal(kx, (S, B, D), jnp.float32)  # elm_agg_emb / feat_cat

    fused = build_fused_head_params(key, D, out_dims)

    # Pure-JAX reference (f32 math on the bf16-stored weights).
    xp = jnp.transpose(feat_cat, (1, 0, 2))  # (B, S, D)
    refs = {}
    for i, prefix in enumerate(fused["prefixes"]):
        L = out_dims[prefix]
        w1 = fused["w1s"][i, :D, :D].astype(jnp.float32)
        b1 = fused["b1s"][i, 0, :D]
        w2 = fused["w2s"][i, :D, :L].astype(jnp.float32)
        b2 = fused["b2s"][i, 0, :L]
        refs[prefix] = jnp.maximum(xp @ w1 + b1, 0.0) @ w2 + b2

    # Exercise both the resident-weights path and the heads-outer streaming path.
    for path in ("resident", "streaming"):
        outs = mlp_forward(feat_cat, fused, force_path=path)
        outs = jax.tree_util.tree_map(jax.block_until_ready, outs)
        for prefix in fused["prefixes"]:
            L = out_dims[prefix]
            assert outs[prefix].shape == (B, S, L)
            err = float(jnp.max(jnp.abs(outs[prefix] - refs[prefix])))
            assert jnp.allclose(outs[prefix], refs[prefix], atol=1e-3, rtol=2e-2), \
                (path, prefix, err)

    print("KERNEL_OK")
</pallas_src>

<mosaic_0001>
module attributes {stable_mosaic.version = 11 : i64} {
  func.func @_resident_heads_kernel(%arg0: i32, %arg1: memref<16x128xbf16, #tpu.memory_space<vmem>>, %arg2: memref<128x384xbf16, #tpu.memory_space<vmem>>, %arg3: memref<3x1x128xf32, #tpu.memory_space<vmem>>, %arg4: memref<3x128x128xbf16, #tpu.memory_space<vmem>>, %arg5: memref<3x1x128xf32, #tpu.memory_space<vmem>>, %arg6: memref<3x16x128xf32, #tpu.memory_space<vmem>>) attributes {dimension_semantics = [#tpu.dimension_semantics<parallel>], iteration_bounds = array<i64: 1>, scalar_prefetch = 0 : i64, scratch_operands = 0 : i64, tpu.core_type = #tpu.core_type<tc>, window_params = [{transform_indices = @transform_0, window_bounds = array<i64: 16, 128>}, {pipeline_mode = #tpu.pipeline_mode<synchronous>, transform_indices = @transform_1, window_bounds = array<i64: 128, 384>}, {pipeline_mode = #tpu.pipeline_mode<synchronous>, transform_indices = @transform_2, window_bounds = array<i64: 3, 1, 128>}, {pipeline_mode = #tpu.pipeline_mode<synchronous>, transform_indices = @transform_3, window_bounds = array<i64: 3, 128, 128>}, {pipeline_mode = #tpu.pipeline_mode<synchronous>, transform_indices = @transform_4, window_bounds = array<i64: 3, 1, 128>}, {transform_indices = @transform_5, window_bounds = array<i64: 3, 16, 128>}]} {
    %c0 = arith.constant 0 : index
    %c0_0 = arith.constant 0 : index
    %0 = vector.load %arg1[%c0, %c0_0] : memref<16x128xbf16, #tpu.memory_space<vmem>>, vector<16x128xbf16>
    %c0_1 = arith.constant 0 : index
    %c0_2 = arith.constant 0 : index
    %1 = vector.load %arg2[%c0_1, %c0_2] : memref<128x384xbf16, #tpu.memory_space<vmem>>, vector<128x384xbf16>
    %cst = arith.constant dense<0.000000e+00> : vector<16x384xf32>
    %2 = tpu.matmul %0, %1, %cst {dimension_numbers = #tpu.dot_dimension_numbers<[1], [0], [0], [1], [0, 0, 1, 1], [], []>} : vector<16x128xbf16>, vector<128x384xbf16>, vector<16x384xf32> -> vector<16x384xf32>
    %3 = vector.extract_strided_slice %2 {offsets = [0, 0], sizes = [16, 128], strides = [1, 1]} : vector<16x384xf32> to vector<16x128xf32>
    %c0_3 = arith.constant 0 : index
    %c0_4 = arith.constant 0 : index
    %c0_5 = arith.constant 0 : index
    %4 = vector.load %arg3[%c0_3, %c0_4, %c0_5] : memref<3x1x128xf32, #tpu.memory_space<vmem>>, vector<1x1x128xf32>
    %5 = vector.shape_cast %4 : vector<1x1x128xf32> to vector<1x128xf32>
    %6 = vector.broadcast %5 : vector<1x128xf32> to vector<16x128xf32>
    %7 = arith.addf %3, %6 : vector<16x128xf32>
    %cst_6 = arith.constant 0.000000e+00 : f32
    %8 = vector.broadcast %cst_6 : f32 to vector<16x128xf32>
    %9 = arith.maximumf %7, %8 : vector<16x128xf32>
    %10 = arith.truncf %9 : vector<16x128xf32> to vector<16x128xbf16>
    %c0_7 = arith.constant 0 : index
    %c0_8 = arith.constant 0 : index
    %c0_9 = arith.constant 0 : index
    %11 = vector.load %arg4[%c0_7, %c0_8, %c0_9] : memref<3x128x128xbf16, #tpu.memory_space<vmem>>, vector<1x128x128xbf16>
    %12 = vector.shape_cast %11 : vector<1x128x128xbf16> to vector<128x128xbf16>
    %cst_10 = arith.constant dense<0.000000e+00> : vector<16x128xf32>
    %13 = tpu.matmul %10, %12, %cst_10 {dimension_numbers = #tpu.dot_dimension_numbers<[1], [0], [0], [1], [0, 0, 1, 1], [], []>} : vector<16x128xbf16>, vector<128x128xbf16>, vector<16x128xf32> -> vector<16x128xf32>
    %c0_11 = arith.constant 0 : index
    %c0_12 = arith.constant 0 : index
    %c0_13 = arith.constant 0 : index
    %14 = vector.load %arg5[%c0_11, %c0_12, %c0_13] : memref<3x1x128xf32, #tpu.memory_space<vmem>>, vector<1x1x128xf32>
    %15 = vector.shape_cast %14 : vector<1x1x128xf32> to vector<1x128xf32>
    %16 = vector.broadcast %15 : vector<1x128xf32> to vector<16x128xf32>
    %17 = arith.addf %13, %16 : vector<16x128xf32>
    %c0_14 = arith.constant 0 : index
    %c0_15 = arith.constant 0 : index
    %c0_16 = arith.constant 0 : index
    %18 = vector.load %arg6[%c0_14, %c0_15, %c0_16] : memref<3x16x128xf32, #tpu.memory_space<vmem>>, vector<1x16x128xf32>
    %19 = vector.shape_cast %18 : vector<1x16x128xf32> to vector<16x128xf32>
    %20 = vector.shape_cast %17 : vector<16x128xf32> to vector<1x16x128xf32>
    tpu.vector_store %arg6[%c0_14, %c0_15, %c0_16], %20 {strides = array<i32>} : memref<3x16x128xf32, #tpu.memory_space<vmem>>, vector<1x16x128xf32>,
    %21 = vector.extract_strided_slice %2 {offsets = [0, 128], sizes = [16, 128], strides = [1, 1]} : vector<16x384xf32> to vector<16x128xf32>
    %c1 = arith.constant 1 : index
    %c0_17 = arith.constant 0 : index
    %c0_18 = arith.constant 0 : index
    %22 = vector.load %arg3[%c1, %c0_17, %c0_18] : memref<3x1x128xf32, #tpu.memory_space<vmem>>, vector<1x1x128xf32>
    %23 = vector.shape_cast %22 : vector<1x1x128xf32> to vector<1x128xf32>
    %24 = vector.broadcast %23 : vector<1x128xf32> to vector<16x128xf32>
    %25 = arith.addf %21, %24 : vector<16x128xf32>
    %cst_19 = arith.constant 0.000000e+00 : f32
    %26 = vector.broadcast %cst_19 : f32 to vector<16x128xf32>
    %27 = arith.maximumf %25, %26 : vector<16x128xf32>
    %28 = arith.truncf %27 : vector<16x128xf32> to vector<16x128xbf16>
    %c1_20 = arith.constant 1 : index
    %c0_21 = arith.constant 0 : index
    %c0_22 = arith.constant 0 : index
    %29 = vector.load %arg4[%c1_20, %c0_21, %c0_22] : memref<3x128x128xbf16, #tpu.memory_space<vmem>>, vector<1x128x128xbf16>
    %30 = vector.shape_cast %29 : vector<1x128x128xbf16> to vector<128x128xbf16>
    %cst_23 = arith.constant dense<0.000000e+00> : vector<16x128xf32>
    %31 = tpu.matmul %28, %30, %cst_23 {dimension_numbers = #tpu.dot_dimension_numbers<[1], [0], [0], [1], [0, 0, 1, 1], [], []>} : vector<16x128xbf16>, vector<128x128xbf16>, vector<16x128xf32> -> vector<16x128xf32>
    %c1_24 = arith.constant 1 : index
    %c0_25 = arith.constant 0 : index
    %c0_26 = arith.constant 0 : index
    %32 = vector.load %arg5[%c1_24, %c0_25, %c0_26] : memref<3x1x128xf32, #tpu.memory_space<vmem>>, vector<1x1x128xf32>
    %33 = vector.shape_cast %32 : vector<1x1x128xf32> to vector<1x128xf32>
    %34 = vector.broadcast %33 : vector<1x128xf32> to vector<16x128xf32>
    %35 = arith.addf %31, %34 : vector<16x128xf32>
    %c1_27 = arith.constant 1 : index
    %c0_28 = arith.constant 0 : index
    %c0_29 = arith.constant 0 : index
    %36 = vector.load %arg6[%c1_27, %c0_28, %c0_29] : memref<3x16x128xf32, #tpu.memory_space<vmem>>, vector<1x16x128xf32>
    %37 = vector.shape_cast %36 : vector<1x16x128xf32> to vector<16x128xf32>
    %38 = vector.shape_cast %35 : vector<16x128xf32> to vector<1x16x128xf32>
    tpu.vector_store %arg6[%c1_27, %c0_28, %c0_29], %38 {strides = array<i32>} : memref<3x16x128xf32, #tpu.memory_space<vmem>>, vector<1x16x128xf32>,
    %39 = vector.extract_strided_slice %2 {offsets = [0, 256], sizes = [16, 128], strides = [1, 1]} : vector<16x384xf32> to vector<16x128xf32>
    %c2 = arith.constant 2 : index
    %c0_30 = arith.constant 0 : index
    %c0_31 = arith.constant 0 : index
    %40 = vector.load %arg3[%c2, %c0_30, %c0_31] : memref<3x1x128xf32, #tpu.memory_space<vmem>>, vector<1x1x128xf32>
    %41 = vector.shape_cast %40 : vector<1x1x128xf32> to vector<1x128xf32>
    %42 = vector.broadcast %41 : vector<1x128xf32> to vector<16x128xf32>
    %43 = arith.addf %39, %42 : vector<16x128xf32>
    %cst_32 = arith.constant 0.000000e+00 : f32
    %44 = vector.broadcast %cst_32 : f32 to vector<16x128xf32>
    %45 = arith.maximumf %43, %44 : vector<16x128xf32>
    %46 = arith.truncf %45 : vector<16x128xf32> to vector<16x128xbf16>
    %c2_33 = arith.constant 2 : index
    %c0_34 = arith.constant 0 : index
    %c0_35 = arith.constant 0 : index
    %47 = vector.load %arg4[%c2_33, %c0_34, %c0_35] : memref<3x128x128xbf16, #tpu.memory_space<vmem>>, vector<1x128x128xbf16>
    %48 = vector.shape_cast %47 : vector<1x128x128xbf16> to vector<128x128xbf16>
    %cst_36 = arith.constant dense<0.000000e+00> : vector<16x128xf32>
    %49 = tpu.matmul %46, %48, %cst_36 {dimension_numbers = #tpu.dot_dimension_numbers<[1], [0], [0], [1], [0, 0, 1, 1], [], []>} : vector<16x128xbf16>, vector<128x128xbf16>, vector<16x128xf32> -> vector<16x128xf32>
    %c2_37 = arith.constant 2 : index
    %c0_38 = arith.constant 0 : index
    %c0_39 = arith.constant 0 : index
    %50 = vector.load %arg5[%c2_37, %c0_38, %c0_39] : memref<3x1x128xf32, #tpu.memory_space<vmem>>, vector<1x1x128xf32>
    %51 = vector.shape_cast %50 : vector<1x1x128xf32> to vector<1x128xf32>
    %52 = vector.broadcast %51 : vector<1x128xf32> to vector<16x128xf32>
    %53 = arith.addf %49, %52 : vector<16x128xf32>
    %c2_40 = arith.constant 2 : index
    %c0_41 = arith.constant 0 : index
    %c0_42 = arith.constant 0 : index
    %54 = vector.load %arg6[%c2_40, %c0_41, %c0_42] : memref<3x16x128xf32, #tpu.memory_space<vmem>>, vector<1x16x128xf32>
    %55 = vector.shape_cast %54 : vector<1x16x128xf32> to vector<16x128xf32>
    %56 = vector.shape_cast %53 : vector<16x128xf32> to vector<1x16x128xf32>
    tpu.vector_store %arg6[%c2_40, %c0_41, %c0_42], %56 {strides = array<i32>} : memref<3x16x128xf32, #tpu.memory_space<vmem>>, vector<1x16x128xf32>,
    return
  }
  func.func @transform_0(%arg0: i32) -> (i32, i32) {
    %c0_i32 = arith.constant 0 : i32
    %c0_i32_0 = arith.constant 0 : i32
    return %arg0, %c0_i32 : i32, i32
  }
  func.func @transform_1(%arg0: i32) -> (i32, i32) {
    %c0_i32 = arith.constant 0 : i32
    %c0_i32_0 = arith.constant 0 : i32
    %c0_i32_1 = arith.constant 0 : i32
    return %c0_i32, %c0_i32_0 : i32, i32
  }
  func.func @transform_2(%arg0: i32) -> (i32, i32, i32) {
    %c0_i32 = arith.constant 0 : i32
    %c0_i32_0 = arith.constant 0 : i32
    %c0_i32_1 = arith.constant 0 : i32
    %c0_i32_2 = arith.constant 0 : i32
    return %c0_i32, %c0_i32_0, %c0_i32_1 : i32, i32, i32
  }
  func.func @transform_3(%arg0: i32) -> (i32, i32, i32) {
    %c0_i32 = arith.constant 0 : i32
    %c0_i32_0 = arith.constant 0 : i32
    %c0_i32_1 = arith.constant 0 : i32
    %c0_i32_2 = arith.constant 0 : i32
    return %c0_i32, %c0_i32_0, %c0_i32_1 : i32, i32, i32
  }
  func.func @transform_4(%arg0: i32) -> (i32, i32, i32) {
    %c0_i32 = arith.constant 0 : i32
    %c0_i32_0 = arith.constant 0 : i32
    %c0_i32_1 = arith.constant 0 : i32
    %c0_i32_2 = arith.constant 0 : i32
    return %c0_i32, %c0_i32_0, %c0_i32_1 : i32, i32, i32
  }
  func.func @transform_5(%arg0: i32) -> (i32, i32, i32) {
    %c0_i32 = arith.constant 0 : i32
    %c0_i32_0 = arith.constant 0 : i32
    %c0_i32_1 = arith.constant 0 : i32
    return %c0_i32, %arg0, %c0_i32_0 : i32, i32, i32
  }
}

</mosaic_0001>

<bundles_post_ra>
// kernel: tpu_custom_call.1
= control target key start
LH: loop header
LB: loop body
LE: loop exit
PB: predicated region body
PF: predicated region fallthrough
CT: control target
= control target key end

     0   :  { %10 = vsyncpa [#allocation3], 0  ;;  %s1207_s0 = inlined_call_operand.hbm [shape: bf16[16,128], index: 0, kind: input, shape index: {}]   ;;  %s1208_s1 = inlined_call_operand.hbm [shape: bf16[128,384], index: 1, kind: input, shape index: {}]   ;;  %s1209_s2 = inlined_call_operand.vmem [shape: f32[3,1,128], index: 2, kind: input, shape index: {}]   ;;  %s1210_s3 = inlined_call_operand.hbm [shape: bf16[3,128,128], index: 3, kind: input, shape index: {}]   ;;  %s1211_s4 = inlined_call_operand.vmem [shape: f32[3,1,128], index: 4, kind: input, shape index: {}]   ;;  %s1212_s5 = inlined_call_operand.hbm [shape: f32[3,16,128], index: 5, kind: output, shape index: {}]  }
   0x1   :  { %11 = vsyncpa [#allocation6], 0 }
   0x2   :  { %12 = vsyncpa [#allocation4], 0  ;;  %s1058_s18 = smov [#allocation5]   ;;  %s964_s22 = scalar_lea.hbm %s1208_s1, 3072 }
   0x3   :  { %s30_s19 = sshll.u32 %s1058_s18, 4  ;;  %p965_p0 = scmp.ne.s32.totalorder %s1208_s1, %s964_s22  ;;  %s31_s19 = int_to_ptr.vmem [resolvable:$true] %s30_s19 }
   0x4   :  { %p968_p1 = scmp.lt.u32.totalorder %s964_s22, %s1208_s1 }
   0x6   :  { %p970_p2 = pnand %p968_p1, %p965_p0 }
   0x8   :  { %973 = shalt.err (!%p970_p2)
}
   0x9   :  { %s974_s27 = scalar_lea.vmem %s31_s19, 3072  ;;  %p979_p4 = scmp.lt.s32.totalorder %s31_s19, %s31_s19 }
   0xa   :  { %p975_p3 = scmp.ne.s32.totalorder %s31_s19, %s974_s27  ;;  %p980_p5 = scmp.lt.s32.totalorder %s974_s27, %s974_s27 }
   0xc   :  { %p981_p6 = por %p980_p5, %p979_p4 }
   0xe   :  { %p982_p7 = pnand %p981_p6, %p975_p3 }
  0x10   :  { %985 = shalt.err (!%p982_p7)
}
  0x11   :  { %s1059_s28 = smov 192   ;;  %s1060_s29 = smov 12  }
  0x12   :  { %36 = dma.hbm_to_vmem [thread:$0]  %s1208_s1, 3072, %s31_s19, [#allocation6], %s1059_s28, %s1059_s28, %s1060_s29  }
  0x13   :  { %s1061_s7 = smov [#allocation2]   ;;  %s986_s11 = scalar_lea.hbm %s1207_s0, 128 }
  0x14   :  { %s18_s8 = sshll.u32 %s1061_s7, 4  ;;  %p987_p8 = scmp.ne.s32.totalorder %s1207_s0, %s986_s11  ;;  %s19_s8 = int_to_ptr.vmem [resolvable:$true] %s18_s8 }
  0x15   :  { %p990_p9 = scmp.lt.u32.totalorder %s986_s11, %s1207_s0 }
  0x17   :  { %p992_p10 = pnand %p990_p9, %p987_p8 }
  0x19   :  { %995 = shalt.err (!%p992_p10)
}
  0x1a   :  { %s996_s16 = scalar_lea.vmem %s19_s8, 128  ;;  %p1001_p12 = scmp.lt.s32.totalorder %s19_s8, %s19_s8 }
  0x1b   :  { %p997_p11 = scmp.ne.s32.totalorder %s19_s8, %s996_s16  ;;  %p1002_p13 = scmp.lt.s32.totalorder %s996_s16, %s996_s16 }
  0x1d   :  { %p1003_p0 = por %p1002_p13, %p1001_p12 }
  0x1f   :  { %p1004_p1 = pnand %p1003_p0, %p997_p11 }
  0x21   :  { %1007 = shalt.err (!%p1004_p1)
}
  0x22   :  { %s1062_s1 = smov 64   ;;  %s1063_s17 = smov 4  }
  0x23   :  { %24 = dma.hbm_to_vmem [thread:$0]  %s1207_s0, 128, %s19_s8, [#allocation3], %s1062_s1, %s1062_s1, %s1063_s17  }
  0x24   :  { %s1064_s20 = smov [#allocation7]   ;;  %s1008_s24 = scalar_lea.hbm %s1210_s3, 3072 }
  0x25   :  { %s44_s21 = sshll.u32 %s1064_s20, 4  ;;  %p1009_p2 = scmp.ne.s32.totalorder %s1210_s3, %s1008_s24  ;;  %s45_s21 = int_to_ptr.vmem [resolvable:$true] %s44_s21 }
  0x26   :  { %p1012_p3 = scmp.lt.u32.totalorder %s1008_s24, %s1210_s3 }
  0x28   :  { %p1014_p4 = pnand %p1012_p3, %p1009_p2 }
  0x2a   :  { %1017 = shalt.err (!%p1014_p4)
}
  0x2b   :  { %s1018_s29 = scalar_lea.vmem %s45_s21, 3072  ;;  %p1023_p6 = scmp.lt.s32.totalorder %s45_s21, %s45_s21 }
  0x2c   :  { %p1019_p5 = scmp.ne.s32.totalorder %s45_s21, %s1018_s29  ;;  %p1024_p7 = scmp.lt.s32.totalorder %s1018_s29, %s1018_s29 }
  0x2e   :  { %p1025_p8 = por %p1024_p7, %p1023_p6 }
  0x30   :  { %p1026_p9 = pnand %p1025_p8, %p1019_p5 }
  0x32   :  { %1029 = shalt.err (!%p1026_p9)
}
  0x33   :  { %50 = dma.hbm_to_vmem [thread:$0]  %s1210_s3, 3072, %s45_s21, [#allocation6], %s1062_s1, %s1062_s1, %s1063_s17  }
  0x34   :  { %1052 = dma.done.wait [#allocation3], 128  }
  0x35   :  { %1053 = vsyncadd [#allocation3], 4294967168 }
  0x36   :  { %1054 = dma.done.wait [#allocation6], 6144  }
  0x37   :  { %1055 = vsyncadd [#allocation6], 4294961152  ;;  %v1065_v0 = vmov 0.0   ;;  %v1066_v1 = vmov 0   ;;  %vm1067_vm0 = vmmov 0   ;;  %v932_v24 = vld [vmem:[#allocation2] sm:$0xff]  }
  0x38   :  { %814 = vmatprep.subr.bf16.mxu1 %v1065_v0  ;;  %263 = vmatprep.mubr.bf16.mxu0 %v1066_v1  ;;  %v907_v2 = vld [vmem:[#allocation5 + $0x4] ss:$12 sps:$4 sm:$0xff]   ;;  %v909_v3 = vld [vmem:[#allocation5] ss:$12 sps:$4 sm:$0xff]   ;;  %v910_v4 = vld [vmem:[#allocation5 + $0x1c] ss:$12 sps:$4 sm:$0xff]  }
  0x39   :  { %830 = vmatprep.mubr.msk.bf16.mxu1 %vm1067_vm0, %v1065_v0  ;;  %231 = vmatprep.subr.bf16.mxu0 %v907_v2  ;;  %v912_v5 = vld [vmem:[#allocation5 + $0x18] ss:$12 sps:$4 sm:$0xff]   ;;  %v913_v6 = vld [vmem:[#allocation5 + $0x34] ss:$12 sps:$4 sm:$0xff]   ;;  %v915_v7 = vld [vmem:[#allocation5 + $0x30] ss:$12 sps:$4 sm:$0xff]  }
  0x3a   :  { %232 = vmatpush1.bf16.msra.mxu0 %v909_v3  ;;  %v916_v8 = vld [vmem:[#allocation5 + $0x4c] ss:$12 sps:$4 sm:$0xff]   ;;  %v918_v9 = vld [vmem:[#allocation5 + $0x48] ss:$12 sps:$4 sm:$0xff]   ;;  %v919_v11 = vld [vmem:[#allocation5 + $0x64] ss:$12 sps:$4 sm:$0xff]  }
  0x3b   :  { %233 = vmatprep.subr.bf16.mxu0 %v910_v4  ;;  %v931_v10 = vld [vmem:[#allocation5 + $0x8] ss:$12 sps:$4 sm:$0xff]   ;;  %v933_v12 = vld [vmem:[#allocation5 + $0x20] ss:$12 sps:$4 sm:$0xff]   ;;  %v934_v15 = vld [vmem:[#allocation5 + $0x38] ss:$12 sps:$4 sm:$0xff]  }
  0x3c   :  { %815 = vmatpush3.bf16.msra.mxu1 %v931_v10  ;;  %v921_v13 = vld [vmem:[#allocation5 + $0x60] ss:$12 sps:$4 sm:$0xff]   ;;  %v922_v14 = vld [vmem:[#allocation5 + $0x7c] ss:$12 sps:$4 sm:$0xff]   ;;  %v924_v16 = vld [vmem:[#allocation5 + $0x78] ss:$12 sps:$4 sm:$0xff]  }
  0x3d   :  { %816 = vmatprep.subr.bf16.mxu1 %v1065_v0  ;;  %v925_v17 = vld [vmem:[#allocation5 + $0x94] ss:$12 sps:$4 sm:$0xff]   ;;  %v935_v18 = vld [vmem:[#allocation5 + $0x50] ss:$12 sps:$4 sm:$0xff]   ;;  %v928_v20 = vld [vmem:[#allocation5 + $0xac] ss:$12 sps:$4 sm:$0xff]  }
  0x3e   :  { %234 = vmatpush1.bf16.msra.mxu0 %v912_v5  ;;  %v927_v19 = vld [vmem:[#allocation5 + $0x90] ss:$12 sps:$4 sm:$0xff]   ;;  %v936_v21 = vld [vmem:[#allocation5 + $0x68] ss:$12 sps:$4 sm:$0xff]   ;;  %v937_v23 = vld [vmem:[#allocation5 + $0x80] ss:$12 sps:$4 sm:$0xff]  }
  0x3f   :  { %235 = vmatprep.subr.bf16.mxu0 %v913_v6  ;;  %v930_v22 = vld [vmem:[#allocation5 + $0xa8] ss:$12 sps:$4 sm:$0xff]   ;;  %v938_v25 = vld [vmem:[#allocation5 + $0x98] ss:$12 sps:$4 sm:$0xff]   ;;  %v939_v28 = vld [vmem:[#allocation5 + $0xb0] ss:$12 sps:$4 sm:$0xff]  }
  0x40   :  { %817 = vmatpush3.bf16.msra.mxu1 %v933_v12  ;;  %v940_v26 = vld [vmem:[#allocation7] sm:$0xff]   ;;  %v942_v27 = vld [vmem:[#allocation7 + $0x8] sm:$0xff]   ;;  %v944_v29 = vld [vmem:[#allocation7 + $0x10] sm:$0xff]   ;;  %s1068_s16 = smov [#allocation8]  }
  0x41   :  { %818 = vmatprep.subr.bf16.mxu1 %v1065_v0  ;;  %v941_v30 = vld [vmem:[#allocation7 + $0x40] sm:$0xff]   ;;  %v946_v31 = vld [vmem:[#allocation7 + $0x18] sm:$0xff]   ;;  %v943_v32 = vld [vmem:[#allocation7 + $0x48] sm:$0xff]   ;;  %s706_s1 = sshll.u32 %s1068_s16, 4  ;;  %s707_s1 = int_to_ptr.vmem [resolvable:$true] %s706_s1 }
  0x42   :  { %236 = vmatpush1.bf16.msra.mxu0 %v915_v7  ;;  %v948_v33 = vld [vmem:[#allocation7 + $0x20] sm:$0xff]   ;;  %v945_v34 = vld [vmem:[#allocation7 + $0x50] sm:$0xff]   ;;  %v950_v35 = vld [vmem:[#allocation7 + $0x28] sm:$0xff]   ;;  %s1030_s17 = scalar_lea.vmem %s707_s1, 768  ;;  %p1035_p11 = scmp.lt.s32.totalorder %s707_s1, %s707_s1 }
  0x43   :  { %237 = vmatprep.subr.bf16.mxu0 %v916_v8  ;;  %v947_v36 = vld [vmem:[#allocation7 + $0x58] sm:$0xff]   ;;  %v949_v37 = vld [vmem:[#allocation7 + $0x60] sm:$0xff]   ;;  %v951_v38 = vld [vmem:[#allocation7 + $0x68] sm:$0xff]   ;;  %p1031_p10 = scmp.ne.s32.totalorder %s707_s1, %s1030_s17  ;;  %p1036_p12 = scmp.lt.s32.totalorder %s1030_s17, %s1030_s17 }
  0x44   :  { %819 = vmatpush3.bf16.msra.mxu1 %v934_v15  ;;  %v952_v39 = vld [vmem:[#allocation7 + $0x30] sm:$0xff]   ;;  %v954_v41 = vld [vmem:[#allocation7 + $0x38] sm:$0xff]   ;;  %v956_v57 = vld [vmem:[#allocation7 + $0x80] sm:$0xff]  }
  0x45   :  { %820 = vmatprep.subr.bf16.mxu1 %v1065_v0  ;;  %v953_v40 = vld [vmem:[#allocation7 + $0x70] sm:$0xff]   ;;  %v955_v42 = vld [vmem:[#allocation7 + $0x78] sm:$0xff]   ;;  %v957_v61 = vld [vmem:[#allocation7 + $0x88] sm:$0xff]   ;;  %p1037_p13 = por %p1036_p12, %p1035_p11 }
  0x46   :  { %238 = vmatpush1.bf16.msra.mxu0 %v918_v9  ;;  %v744_v43 = vld [vmem:[%s1209_s2] ss:$0 sm:$0xff]  ;;  %v755_v44 = vld [vmem:[%s1209_s2 + $0x1] ss:$0 sm:$0xff]  ;;  %v767_v60 = vld [vmem:[%s1209_s2 + $0x2] ss:$0 sm:$0xff] }
  0x47   :  { %239 = vmatprep.subr.bf16.mxu0 %v919_v11  ;;  %v958_v6 = vld [vmem:[#allocation7 + $0x90] sm:$0xff]   ;;  %v959_v9 = vld [vmem:[#allocation7 + $0x98] sm:$0xff]   ;;  %v960_v10 = vld [vmem:[#allocation7 + $0xa0] sm:$0xff]   ;;  %p1038_p0 = pnand %p1037_p13, %p1031_p10 }
  0x48   :  { %821 = vmatpush3.bf16.msra.mxu1 %v935_v18  ;;  %v961_v11 = vld [vmem:[#allocation7 + $0xa8] sm:$0xff]   ;;  %v962_v12 = vld [vmem:[#allocation7 + $0xb0] sm:$0xff]   ;;  %v757_v15 = vld [vmem:[%s1211_s4 + $0x1] ss:$0 sm:$0xff] }
  0x49   :  { %822 = vmatprep.subr.bf16.mxu1 %v1065_v0 }
  0x4a   :  { %240 = vmatpush1.bf16.msra.mxu0 %v921_v13  ;;  %v963_v13 = vld [vmem:[#allocation7 + $0xb8] sm:$0xff]  }
  0x4b   :  { %241 = vmatprep.subr.bf16.mxu0 %v922_v14  ;;  %v745_v14 = vld [vmem:[%s1211_s4] ss:$0 sm:$0xff] }
  0x4c   :  { %823 = vmatpush3.bf16.msra.mxu1 %v936_v21 }
  0x4d   :  { %824 = vmatprep.subr.bf16.mxu1 %v1065_v0 }
  0x4e   :  { %242 = vmatpush1.bf16.msra.mxu0 %v924_v16 }
  0x4f   :  { %243 = vmatprep.subr.bf16.mxu0 %v925_v17 }
  0x50   :  { %825 = vmatpush3.bf16.msra.mxu1 %v937_v23 }
  0x51   :  { %826 = vmatprep.subr.bf16.mxu1 %v1065_v0 }
  0x52   :  { %244 = vmatpush1.bf16.msra.mxu0 %v927_v19 }
  0x53   :  { %245 = vmatprep.subr.bf16.mxu0 %v928_v20 }
  0x54   :  { %827 = vmatpush3.bf16.msra.mxu1 %v938_v25 }
  0x55   :  { %828 = vmatprep.subr.bf16.mxu1 %v1065_v0 }
  0x56   :  { %246 = vmatpush1.bf16.msra.mxu0 %v930_v22 }
  0x57   :  { %834 = vmatprep.subr.bf16.mxu0 %v1065_v0 }
  0x58   :  { %829 = vmatpush3.bf16.msra.mxu1 %v939_v28 }
  0x59   :  { %264 = vmatmul.mubr.bf16.vlgmr.msra.gmra.mrb[0].mxu0 %v932_v24  ;;  %854 = vmatprep.subr.bf16.mxu1 %v1065_v0 }
  0x5a   :  { %835 = vmatpush3.bf16.msra.mxu0 %v940_v26  ;;  %850 = vmatprep.mubr.msk.bf16.mxu0 %vm1067_vm0, %v1065_v0 }
  0x5b   :  { %836 = vmatprep.subr.bf16.mxu0 %v1065_v0  ;;  %831 = vmatmul.mubr.bf16.vlgmr.msra.gmra.mrb[0].mxu1 %v932_v24 }
  0x5c   :  { %855 = vmatpush3.bf16.msra.mxu1 %v941_v30  ;;  %870 = vmatprep.mubr.msk.bf16.mxu1 %vm1067_vm0, %v1065_v0 }
  0x5d   :  { %856 = vmatprep.subr.bf16.mxu1 %v1065_v0 }
  0x5e   :  { %837 = vmatpush3.bf16.msra.mxu0 %v942_v27  ;;  %v769_v27 = vld [vmem:[%s1211_s4 + $0x2] ss:$0 sm:$0xff] }
  0x5f   :  { %838 = vmatprep.subr.bf16.mxu0 %v1065_v0 }
  0x60   :  { %857 = vmatpush3.bf16.msra.mxu1 %v943_v32 }
  0x61   :  { %858 = vmatprep.subr.bf16.mxu1 %v1065_v0 }
  0x62   :  { %839 = vmatpush3.bf16.msra.mxu0 %v944_v29 }
  0x63   :  { %840 = vmatprep.subr.bf16.mxu0 %v1065_v0 }
  0x64   :  { %859 = vmatpush3.bf16.msra.mxu1 %v945_v34 }
  0x65   :  { %860 = vmatprep.subr.bf16.mxu1 %v1065_v0 }
  0x66   :  { %841 = vmatpush3.bf16.msra.mxu0 %v946_v31 }
  0x67   :  { %842 = vmatprep.subr.bf16.mxu0 %v1065_v0 }
  0x68   :  { %861 = vmatpush3.bf16.msra.mxu1 %v947_v36 }
  0x69   :  { %862 = vmatprep.subr.bf16.mxu1 %v1065_v0 }
  0x6a   :  { %843 = vmatpush3.bf16.msra.mxu0 %v948_v33 }
  0x6b   :  { %844 = vmatprep.subr.bf16.mxu0 %v1065_v0 }
  0x6c   :  { %863 = vmatpush3.bf16.msra.mxu1 %v949_v37 }
  0x6d   :  { %864 = vmatprep.subr.bf16.mxu1 %v1065_v0 }
  0x6e   :  { %845 = vmatpush3.bf16.msra.mxu0 %v950_v35 }
  0x6f   :  { %846 = vmatprep.subr.bf16.mxu0 %v1065_v0 }
  0x70   :  { %865 = vmatpush3.bf16.msra.mxu1 %v951_v38 }
  0x71   :  { %866 = vmatprep.subr.bf16.mxu1 %v1065_v0 }
  0x72   :  { %847 = vmatpush3.bf16.msra.mxu0 %v952_v39 }
  0x73   :  { %848 = vmatprep.subr.bf16.mxu0 %v1065_v0 }
  0x74   :  { %867 = vmatpush3.bf16.msra.mxu1 %v953_v40 }
  0x75   :  { %868 = vmatprep.subr.bf16.mxu1 %v1065_v0 }
  0x76   :  { %849 = vmatpush3.bf16.msra.mxu0 %v954_v41 }
  0x77   :  { %874 = vmatprep.subr.bf16.mxu0 %v1065_v0 }
  0x78   :  { %869 = vmatpush3.bf16.msra.mxu1 %v955_v42 }
 0x12c   :  { %v265_v45 = vpop.f32.mrb[0].mxu0 }
 0x12d   :  { %v322_v46 = vadd.f32 %v744_v43, %v265_v45  ;;  %v267_v47 = vpop.f32.mrb[1].mxu0 }
 0x12e   :  { %v449_v48 = vadd.f32 %v755_v44, %v267_v47  ;;  %v269_v49 = vpop.f32.mrb[2].mxu0  ;;  %v308_v62 = vpop.f32.mrb[0].mxu1 }
 0x12f   :  { %v323_v50 = vadd.f32 %v744_v43, %v269_v49  ;;  %v271_v51 = vpop.f32.mrb[3].mxu0  ;;  %v324_v53 = vmax.f32 %v322_v46, 0.0  ;;  %v579_v63 = vadd.f32 %v767_v60, %v308_v62  ;;  %v832_v1 = vpop.f32.mrb[1].mxu1 }
 0x130   :  { %v450_v52 = vadd.f32 %v755_v44, %v271_v51  ;;  %v451_v55 = vmax.f32 %v449_v48, 0.0  ;;  %v311_v2 = vpop.f32.mrb[2].mxu1 }
 0x131   :  { %v325_v54 = vmax.f32 %v323_v50, 0.0  ;;  %v581_v3 = vmax.f32 %v579_v63, 0.0  ;;  %v580_v4 = vadd.f32 %v767_v60, %v311_v2  ;;  %v833_v5 = vpop.f32.mrb[3].mxu1 }
 0x132   :  { %v452_v56 = vmax.f32 %v450_v52, 0.0 }
 0x133   :  { %v326_v58 = vpack.c.bf16 %v325_v54, %v324_v53  ;;  %v582_v7 = vmax.f32 %v580_v4, 0.0 }
 0x134   :  { %v453_v59 = vpack.c.bf16 %v452_v56, %v451_v55 }
 0x135   :  { %851 = vmatmul.mubr.bf16.vlgmr.msra.gmra.mrb[4].mxu0 %v326_v58  ;;  %v583_v8 = vpack.c.bf16 %v582_v7, %v581_v3 }
 0x136   :  { %875 = vmatpush3.bf16.msra.mxu0 %v956_v57  ;;  %871 = vmatmul.mubr.bf16.vlgmr.msra.gmra.mrb[4].mxu1 %v453_v59 }
 0x137   :  { %876 = vmatprep.subr.bf16.mxu0 %v1065_v0  ;;  %890 = vmatprep.mubr.msk.bf16.mxu0 %vm1067_vm0, %v1065_v0 }
 0x13a   :  { %877 = vmatpush3.bf16.msra.mxu0 %v957_v61 }
 0x13b   :  { %878 = vmatprep.subr.bf16.mxu0 %v1065_v0 }
 0x13e   :  { %879 = vmatpush3.bf16.msra.mxu0 %v958_v6 }
 0x13f   :  { %880 = vmatprep.subr.bf16.mxu0 %v1065_v0 }
 0x142   :  { %881 = vmatpush3.bf16.msra.mxu0 %v959_v9 }
 0x143   :  { %882 = vmatprep.subr.bf16.mxu0 %v1065_v0 }
 0x146   :  { %883 = vmatpush3.bf16.msra.mxu0 %v960_v10 }
 0x147   :  { %884 = vmatprep.subr.bf16.mxu0 %v1065_v0 }
 0x14a   :  { %885 = vmatpush3.bf16.msra.mxu0 %v961_v11 }
 0x14b   :  { %886 = vmatprep.subr.bf16.mxu0 %v1065_v0 }
 0x14e   :  { %887 = vmatpush3.bf16.msra.mxu0 %v962_v12 }
 0x14f   :  { %888 = vmatprep.subr.bf16.mxu0 %v1065_v0 }
 0x152   :  { %889 = vmatpush3.bf16.msra.mxu0 %v963_v13 }
 0x155   :  { %891 = vmatmul.mubr.bf16.vlgmr.msra.gmra.mrb[8].mxu0 %v583_v8 }
 0x208   :  { %v432_v16 = vpop.f32.mrb[4].mxu0 }
 0x209   :  { %v433_v17 = vadd.f32 %v745_v14, %v432_v16  ;;  %v852_v18 = vpop.f32.mrb[5].mxu0  ;;  %v561_v19 = vpop.f32.mrb[4].mxu1 }
 0x20a   :  { %v562_v20 = vadd.f32 %v757_v15, %v561_v19  ;;  %v435_v21 = vpop.f32.mrb[6].mxu0  ;;  %v872_v22 = vpop.f32.mrb[5].mxu1 }
 0x20b   :  { %439 = vst [vmem:[#allocation8] sm:$0xff] %v433_v17  ;;  %v436_v23 = vadd.f32 %v745_v14, %v435_v21  ;;  %v853_v0 = vpop.f32.mrb[7].mxu0  ;;  %v564_v24 = vpop.f32.mrb[6].mxu1 }
 0x20c   :  { %569 = vst [vmem:[#allocation8 + $0x10] sm:$0xff] %v562_v20  ;;  %v565_v25 = vadd.f32 %v757_v15, %v564_v24  ;;  %v873_v26 = vpop.f32.mrb[7].mxu1 }
 0x20d   :  { %440 = vst [vmem:[#allocation8 + $0x8] sm:$0xff] %v436_v23 }
 0x20e   :  { %570 = vst [vmem:[#allocation8 + $0x18] sm:$0xff] %v565_v25 }
 0x228   :  { %v691_v28 = vpop.f32.mrb[8].mxu0 }
 0x229   :  { %v692_v29 = vadd.f32 %v769_v27, %v691_v28  ;;  %v892_v30 = vpop.f32.mrb[9].mxu0 }
 0x22a   :  { %v694_v31 = vpop.f32.mrb[10].mxu0 }
 0x22b   :  { %699 = vst [vmem:[#allocation8 + $0x20] sm:$0xff] %v692_v29  ;;  %v695_v32 = vadd.f32 %v769_v27, %v694_v31  ;;  %v893_v33 = vpop.f32.mrb[11].mxu0 }
 0x22d   :  { %700 = vst [vmem:[#allocation8 + $0x28] sm:$0xff] %v695_v32 }
 0x22e   :  { %1041 = shalt.err (!%p1038_p0)
}
 0x22f   :  { %s1042_s19 = scalar_lea.hbm %s1212_s5, 768 }
 0x230   :  { %p1043_p1 = scmp.ne.s32.totalorder %s1212_s5, %s1042_s19  ;;  %p1046_p2 = scmp.lt.u32.totalorder %s1042_s19, %s1212_s5 }
 0x232   :  { %p1048_p3 = pnand %p1046_p2, %p1043_p1 }
 0x234   :  { %1051 = shalt.err (!%p1048_p3)
}
 0x235   :  { %s1069_s24 = smov 128   ;;  %s1070_s25 = smov 8  }
 0x236   :  { %712 = dma.vmem_to_hbm [thread:$0]  %s707_s1, 768, %s1212_s5, [#allocation4], %s1069_s24, %s1069_s24, %s1070_s25  }
 0x237   :  { %1056 = dma.done.wait [#allocation4], 768  }
 0x238   :  { %1057 = vsyncadd [#allocation4], 4294966528 }
 0x239   :  { %716 = vsyncpa [#allocation3], 1 }
 0x23a   :  { %717 = vsyncpa [#allocation6], 1 }
 0x23b   :  { %718 = vsyncpa [#allocation4], 1 }

</bundles_post_ra>
